<compile_context>
chip_gen: v7x
topology: tpu7x:2x2x1
jax: 0.10.0
libtpu: 0.0.40
codegen_flags: <defaults>
</compile_context>

<pallas_src>
import jax
import jax.numpy as jnp
from jax.experimental import pallas as pl
from jax.experimental.pallas import tpu as pltpu


def _round_up(n, m):
    return ((n + m - 1) // m) * m


# ----------------------------------------------------------------------------
# Kernels: clamp(x) @ W' + b'   (normalization already folded into W', b')
# ----------------------------------------------------------------------------
def _clamp_linear_kernel(x_ref, w_ref, b_ref, o_ref):
    # Single-block reduction: the whole (padded) feature axis is resident in
    # VMEM -> no k grid axis, no accumulator scratch, no pl.when.
    x = jnp.clip(x_ref[...], 0.0, 1.0)                       # bf16, exact clamp
    acc = jnp.dot(x, w_ref[...], preferred_element_type=jnp.float32)
    o_ref[...] = acc + b_ref[...]


def _clamp_linear_kernel_kred(x_ref, w_ref, b_ref, o_ref):
    # Fallback for very large F: reduction axis last ("arbitrary"), accumulate
    # directly into the f32 output block, add the bias on the final step.
    k = pl.program_id(2)

    x = jnp.clip(x_ref[...], 0.0, 1.0)
    part = jnp.dot(x, w_ref[...], preferred_element_type=jnp.float32)

    @pl.when(k == 0)
    def _():
        o_ref[...] = jnp.zeros_like(o_ref)

    o_ref[...] += part

    @pl.when(k == pl.num_programs(2) - 1)
    def _():
        o_ref[...] += b_ref[...]


# ----------------------------------------------------------------------------
# One-time setup: fold InputNormalize into the head, pad to TPU tiles.
# ----------------------------------------------------------------------------
_TK_SINGLE_BLOCK_MAX = 2048   # use a single reduction block if F_pad <= this
_TK_FALLBACK = 1024


def prepare_normalized_linear(mean_c, std_c, w, b, spatial_hw):
    """Fold normalization into (W', b') and pad for the kernel.

    Call ONCE and cache the result; only the activations change per call.
    """
    F, K = w.shape
    C = mean_c.shape[0]
    assert F == C * spatial_hw, "weight rows must match C*H*W"

    mean_f = jnp.repeat(mean_c.astype(jnp.float32), spatial_hw)           # (F,)
    inv_std_f = jnp.repeat(1.0 / std_c.astype(jnp.float32), spatial_hw)   # (F,)

    w32 = w.astype(jnp.float32)
    w_fold = w32 * inv_std_f[:, None]                                     # (F, K)
    b_fold = b.astype(jnp.float32).reshape(1, K) - (mean_f * inv_std_f) @ w32

    # Tile sizes along K and F (independent of the batch size).
    tn = 256 if K >= 256 else 128
    K_pad = _round_up(K, tn)

    F_pad = _round_up(F, 128)
    if F_pad <= _TK_SINGLE_BLOCK_MAX:
        tk = F_pad           # whole reduction in one block -> no k grid axis
    else:
        tk = _TK_FALLBACK
        F_pad = _round_up(F, tk)

    # Padded feature rows of W' are zero -> padded x columns contribute 0.
    w_p = jnp.pad(w_fold, ((0, F_pad - F), (0, K_pad - K))).astype(jnp.bfloat16)
    b_p = jnp.pad(b_fold, ((0, 0), (0, K_pad - K)))

    return dict(w_p=w_p, b_p=b_p, F=F, K=K, F_pad=F_pad, K_pad=K_pad,
                tk=tk, tn=tn)


# ----------------------------------------------------------------------------
# NormalizedModel.forward  (normalization folded into the linear stand-in head)
# ----------------------------------------------------------------------------
def normalized_model_forward(x_nchw, params, *, tm_cap=256):
    N = x_nchw.shape[0]
    F, K = params["F"], params["K"]
    F_pad, K_pad = params["F_pad"], params["K_pad"]
    tk, tn = params["tk"], params["tn"]
    w_p, b_p = params["w_p"], params["b_p"]

    # Activations: flatten, store as bf16 in HBM (halves the dominant read),
    # pad batch to the tile and features to F_pad.
    x2d = x_nchw.reshape(N, F).astype(jnp.bfloat16)
    tm = min(tm_cap, _round_up(N, 8))     # big MXU tiles, no huge pad for tiny N
    M_pad = _round_up(N, tm)
    x_p = jnp.pad(x2d, ((0, M_pad - N), (0, F_pad - F)))

    grid_m = M_pad // tm
    grid_n = K_pad // tn
    grid_k = F_pad // tk

    if grid_k == 1:
        out_p = pl.pallas_call(
            _clamp_linear_kernel,
            out_shape=jax.ShapeDtypeStruct((M_pad, K_pad), jnp.float32),
            grid_spec=pltpu.PrefetchScalarGridSpec(
                num_scalar_prefetch=0,
                grid=(grid_m, grid_n),
                in_specs=[
                    pl.BlockSpec((tm, F_pad), lambda i, j: (i, 0)),   # x  (bf16)
                    pl.BlockSpec((F_pad, tn), lambda i, j: (0, j)),   # W' (bf16)
                    pl.BlockSpec((1, tn), lambda i, j: (0, j)),       # b' (f32)
                ],
                out_specs=pl.BlockSpec((tm, tn), lambda i, j: (i, j)),
            ),
            compiler_params=pltpu.CompilerParams(
                dimension_semantics=("parallel", "parallel")),
        )(x_p, w_p, b_p)
    else:
        out_p = pl.pallas_call(
            _clamp_linear_kernel_kred,
            out_shape=jax.ShapeDtypeStruct((M_pad, K_pad), jnp.float32),
            grid_spec=pltpu.PrefetchScalarGridSpec(
                num_scalar_prefetch=0,
                grid=(grid_m, grid_n, grid_k),
                in_specs=[
                    pl.BlockSpec((tm, tk), lambda i, j, k: (i, k)),   # x  (bf16)
                    pl.BlockSpec((tk, tn), lambda i, j, k: (k, j)),   # W' (bf16)
                    pl.BlockSpec((1, tn), lambda i, j, k: (0, j)),    # b' (f32)
                ],
                out_specs=pl.BlockSpec((tm, tn), lambda i, j, k: (i, j)),
            ),
            compiler_params=pltpu.CompilerParams(
                dimension_semantics=("parallel", "parallel", "arbitrary")),
        )(x_p, w_p, b_p)

    return out_p[:N, :K]


if __name__ == "__main__":
    N, C, H, W = 2, 4, 16, 16
    num_classes = 10

    key = jax.random.PRNGKey(0)
    kx, kw, kb = jax.random.split(key, 3)

    # Input image batch in [-0.2, 1.2] so that clamping actually matters.
    x = jax.random.uniform(kx, (N, C, H, W), dtype=jnp.float32,
                           minval=-0.2, maxval=1.2)

    # Per-channel normalization buffers (dataset.mean / dataset.std).
    mean_c = jnp.array([0.485, 0.456, 0.406, 0.5], dtype=jnp.float32)[:C]
    std_c = jnp.array([0.229, 0.224, 0.225, 0.25], dtype=jnp.float32)[:C]

    # Deterministic stand-in linear head parameters.
    F = C * H * W
    w = jax.random.normal(kw, (F, num_classes), dtype=jnp.float32) * 0.02
    b = jax.random.normal(kb, (1, num_classes), dtype=jnp.float32) * 0.02

    # Fold InputNormalize into the head ONCE (cached across forward calls).
    params = prepare_normalized_linear(mean_c, std_c, w, b, spatial_hw=H * W)

    out = normalized_model_forward(x, params)
    out = jax.block_until_ready(out)

    # Pure-JAX f32 reference of the same forward pass.
    x_ref = jnp.clip(x, 0.0, 1.0)
    x_ref = (x_ref - mean_c[None, :, None, None]) / std_c[None, :, None, None]
    ref = x_ref.reshape(N, -1) @ w + b

    assert out.shape == (N, num_classes)
    # bf16 activations/weights with f32 MXU accumulation -> loosened tolerance.
    assert jnp.allclose(out, ref, atol=5e-2, rtol=5e-2), "mismatch vs reference"

    print("KERNEL_OK")
</pallas_src>

<mosaic_0001>
module attributes {stable_mosaic.version = 11 : i64} {
  func.func @_clamp_linear_kernel(%arg0: i32, %arg1: i32, %arg2: memref<8x1024xbf16, #tpu.memory_space<vmem>>, %arg3: memref<1024x128xbf16, #tpu.memory_space<vmem>>, %arg4: memref<1x128xf32, #tpu.memory_space<vmem>>, %arg5: memref<8x128xf32, #tpu.memory_space<vmem>>) attributes {dimension_semantics = [#tpu.dimension_semantics<parallel>, #tpu.dimension_semantics<parallel>], iteration_bounds = array<i64: 1, 1>, scalar_prefetch = 0 : i64, scratch_operands = 0 : i64, tpu.core_type = #tpu.core_type<tc>, window_params = [{transform_indices = @transform_0, window_bounds = array<i64: 8, 1024>}, {transform_indices = @transform_1, window_bounds = array<i64: 1024, 128>}, {transform_indices = @transform_2, window_bounds = array<i64: 1, 128>}, {transform_indices = @transform_3, window_bounds = array<i64: 8, 128>}]} {
    %c0 = arith.constant 0 : index
    %c0_0 = arith.constant 0 : index
    %0 = vector.load %arg2[%c0, %c0_0] : memref<8x1024xbf16, #tpu.memory_space<vmem>>, vector<8x1024xbf16>
    %cst = arith.constant 0.000000e+00 : f32
    %cst_1 = arith.constant 1.000000e+00 : f32
    %1 = arith.truncf %cst : f32 to bf16
    %2 = vector.broadcast %1 : bf16 to vector<8x1024xbf16>
    %3 = arith.maximumf %2, %0 : vector<8x1024xbf16>
    %4 = arith.truncf %cst_1 : f32 to bf16
    %5 = vector.broadcast %4 : bf16 to vector<8x1024xbf16>
    %6 = arith.minimumf %5, %3 : vector<8x1024xbf16>
    %c0_2 = arith.constant 0 : index
    %c0_3 = arith.constant 0 : index
    %7 = vector.load %arg3[%c0_2, %c0_3] : memref<1024x128xbf16, #tpu.memory_space<vmem>>, vector<1024x128xbf16>
    %cst_4 = arith.constant dense<0.000000e+00> : vector<8x128xf32>
    %8 = tpu.matmul %6, %7, %cst_4 {dimension_numbers = #tpu.dot_dimension_numbers<[1], [0], [0], [1], [0, 0, 1, 1], [], []>} : vector<8x1024xbf16>, vector<1024x128xbf16>, vector<8x128xf32> -> vector<8x128xf32>
    %c0_5 = arith.constant 0 : index
    %c0_6 = arith.constant 0 : index
    %9 = vector.load %arg4[%c0_5, %c0_6] : memref<1x128xf32, #tpu.memory_space<vmem>>, vector<1x128xf32>
    %10 = vector.broadcast %9 : vector<1x128xf32> to vector<8x128xf32>
    %11 = arith.addf %8, %10 : vector<8x128xf32>
    %c0_7 = arith.constant 0 : index
    %c0_8 = arith.constant 0 : index
    %12 = vector.load %arg5[%c0_7, %c0_8] : memref<8x128xf32, #tpu.memory_space<vmem>>, vector<8x128xf32>
    tpu.vector_store %arg5[%c0_7, %c0_8], %11 {strides = array<i32>} : memref<8x128xf32, #tpu.memory_space<vmem>>, vector<8x128xf32>,
    return
  }
  func.func @transform_0(%arg0: i32, %arg1: i32) -> (i32, i32) {
    %c0_i32 = arith.constant 0 : i32
    %c0_i32_0 = arith.constant 0 : i32
    return %arg0, %c0_i32 : i32, i32
  }
  func.func @transform_1(%arg0: i32, %arg1: i32) -> (i32, i32) {
    %c0_i32 = arith.constant 0 : i32
    %c0_i32_0 = arith.constant 0 : i32
    return %c0_i32, %arg1 : i32, i32
  }
  func.func @transform_2(%arg0: i32, %arg1: i32) -> (i32, i32) {
    %c0_i32 = arith.constant 0 : i32
    %c0_i32_0 = arith.constant 0 : i32
    return %c0_i32, %arg1 : i32, i32
  }
  func.func @transform_3(%arg0: i32, %arg1: i32) -> (i32, i32) {
    %c0_i32 = arith.constant 0 : i32
    return %arg0, %arg1 : i32, i32
  }
}

</mosaic_0001>

<bundles_post_ra>
// kernel: tpu_custom_call.1
= control target key start
LH: loop header
LB: loop body
LE: loop exit
PB: predicated region body
PF: predicated region fallthrough
CT: control target
= control target key end

     0   :  { %8 = vsyncpa [#allocation3], 0  ;;  %s1164_s0 = inlined_call_operand.hbm [shape: bf16[8,1024], index: 0, kind: input, shape index: {}]   ;;  %s1165_s1 = inlined_call_operand.hbm [shape: bf16[1024,128], index: 1, kind: input, shape index: {}]   ;;  %s1166_s2 = inlined_call_operand.vmem [shape: f32[1,128], index: 2, kind: input, shape index: {}]   ;;  %s1167_s3 = inlined_call_operand.hbm [shape: f32[8,128], index: 3, kind: output, shape index: {}]  }
   0x1   :  { %9 = vsyncpa [#allocation6], 0 }
   0x2   :  { %10 = vsyncpa [#allocation4], 0  ;;  %s1083_s12 = smov [#allocation2]   ;;  %s1084_s14 = smov [#allocation5]  }
   0x3   :  { %s17_s13 = sshll.u32 %s1083_s12, 4  ;;  %s26_s15 = sshll.u32 %s1084_s14, 4  ;;  %s18_s13 = int_to_ptr.vmem [resolvable:$true] %s17_s13  ;;  %s1110_s15 = int_to_ptr.vmem [resolvable:$true] %s26_s15 }
   0x4   :  { %s1011_s18 = scalar_lea.hbm %s1164_s0, 512 }
   0x5   :  { %p1012_p0 = scmp.ne.s32.totalorder %s1164_s0, %s1011_s18  ;;  %p1015_p1 = scmp.lt.u32.totalorder %s1011_s18, %s1164_s0 }
   0x7   :  { %p1017_p2 = pnand %p1015_p1, %p1012_p0 }
   0x9   :  { %1020 = shalt.err (!%p1017_p2)
}
   0xa   :  { %s1021_s23 = scalar_lea.vmem %s18_s13, 512  ;;  %p1026_p4 = scmp.lt.s32.totalorder %s18_s13, %s18_s13 }
   0xb   :  { %p1022_p3 = scmp.ne.s32.totalorder %s18_s13, %s1021_s23  ;;  %p1027_p5 = scmp.lt.s32.totalorder %s1021_s23, %s1021_s23 }
   0xd   :  { %p1028_p6 = por %p1027_p5, %p1026_p4 }
   0xf   :  { %p1029_p7 = pnand %p1028_p6, %p1022_p3 }
  0x11   :  { %1032 = shalt.err (!%p1029_p7)
}
  0x12   :  { %20 = dma.hbm_to_vmem [thread:$0]  %s1164_s0, 512, %s18_s13, [#allocation3]  }
  0x13   :  { %s1033_s28 = scalar_lea.hbm %s1165_s1, 8192 }
  0x14   :  { %p1034_p8 = scmp.ne.s32.totalorder %s1165_s1, %s1033_s28  ;;  %p1037_p9 = scmp.lt.u32.totalorder %s1033_s28, %s1165_s1 }
  0x16   :  { %p1039_p10 = pnand %p1037_p9, %p1034_p8 }
  0x18   :  { %1042 = shalt.err (!%p1039_p10)
}
  0x19   :  { %s1043_s6 = scalar_lea.vmem %s1110_s15, 8192  ;;  %p1048_p12 = scmp.lt.s32.totalorder %s1110_s15, %s1110_s15 }
  0x1a   :  { %p1044_p11 = scmp.ne.s32.totalorder %s1110_s15, %s1043_s6  ;;  %p1049_p13 = scmp.lt.s32.totalorder %s1043_s6, %s1043_s6 }
  0x1c   :  { %p1050_p0 = por %p1049_p13, %p1048_p12 }
  0x1e   :  { %p1051_p1 = pnand %p1050_p0, %p1044_p11 }
  0x20   :  { %1054 = shalt.err (!%p1051_p1)
}
  0x21   :  { %s1085_s0 = smov 64   ;;  %s1086_s7 = smov 4  }
  0x22   :  { %32 = dma.hbm_to_vmem [thread:$0]  %s1165_s1, 8192, %s1110_s15, [#allocation6], %s1085_s0, %s1085_s0, %s1086_s7  }
  0x23   :  { %1077 = dma.done.wait [#allocation3], 512  }
  0x24   :  { %1078 = vsyncadd [#allocation3], 4294966784 }
  0x25   :  { %1079 = dma.done.wait [#allocation6], 8192  }
  0x26   :  { %1080 = vsyncadd [#allocation6], 4294959104  ;;  %v947_v0 = vld [vmem:[#allocation5 + $0x40] sm:$0xff]   ;;  %v951_v4 = vld [vmem:[#allocation5 + $0x48] sm:$0xff]   ;;  %v1087_v34 = vmov 0  }
  0x27   :  { %v948_v1 = vld [vmem:[#allocation5 + $0xc0] sm:$0xff]   ;;  %852 = vmatprep.subr.bf16.mxu0 %v947_v0  ;;  %v952_v5 = vld [vmem:[#allocation5 + $0xc8] sm:$0xff]   ;;  %v955_v8 = vld [vmem:[#allocation5 + $0x50] sm:$0xff]   ;;  %v1088_v39 = vmov 1065369472  }
  0x28   :  { %v949_v2 = vld [vmem:[#allocation5] sm:$0xff]   ;;  %874 = vmatprep.subr.bf16.mxu1 %v948_v1  ;;  %v953_v6 = vld [vmem:[#allocation5 + $0x8] sm:$0xff]   ;;  %v956_v9 = vld [vmem:[#allocation5 + $0xd0] sm:$0xff]  }
  0x29   :  { %v950_v3 = vld [vmem:[#allocation5 + $0x80] sm:$0xff]   ;;  %853 = vmatpush3.bf16.msra.mxu0 %v949_v2  ;;  %v954_v7 = vld [vmem:[#allocation5 + $0x88] sm:$0xff]   ;;  %v957_v10 = vld [vmem:[#allocation5 + $0x10] sm:$0xff]  }
  0x2a   :  { %875 = vmatpush3.bf16.msra.mxu1 %v950_v3  ;;  %854 = vmatprep.subr.bf16.mxu0 %v951_v4  ;;  %v958_v11 = vld [vmem:[#allocation5 + $0x90] sm:$0xff]   ;;  %v959_v12 = vld [vmem:[#allocation5 + $0x58] sm:$0xff]   ;;  %v963_v16 = vld [vmem:[#allocation5 + $0x60] sm:$0xff]  }
  0x2b   :  { %876 = vmatprep.subr.bf16.mxu1 %v952_v5  ;;  %v960_v13 = vld [vmem:[#allocation5 + $0xd8] sm:$0xff]   ;;  %v964_v17 = vld [vmem:[#allocation5 + $0xe0] sm:$0xff]   ;;  %v967_v20 = vld [vmem:[#allocation5 + $0x68] sm:$0xff]  }
  0x2c   :  { %v961_v14 = vld [vmem:[#allocation5 + $0x18] sm:$0xff]   ;;  %v965_v18 = vld [vmem:[#allocation5 + $0x20] sm:$0xff]   ;;  %v968_v21 = vld [vmem:[#allocation5 + $0xe8] sm:$0xff]  }
  0x2d   :  { %855 = vmatpush3.bf16.msra.mxu0 %v953_v6  ;;  %v962_v15 = vld [vmem:[#allocation5 + $0x98] sm:$0xff]   ;;  %v966_v19 = vld [vmem:[#allocation5 + $0xa0] sm:$0xff]   ;;  %v969_v22 = vld [vmem:[#allocation5 + $0x28] sm:$0xff]  }
  0x2e   :  { %877 = vmatpush3.bf16.msra.mxu1 %v954_v7  ;;  %856 = vmatprep.subr.bf16.mxu0 %v955_v8  ;;  %v970_v23 = vld [vmem:[#allocation5 + $0xa8] sm:$0xff]   ;;  %v971_v24 = vld [vmem:[#allocation5 + $0x70] sm:$0xff]   ;;  %v975_v28 = vld [vmem:[#allocation5 + $0x78] sm:$0xff]  }
  0x2f   :  { %878 = vmatprep.subr.bf16.mxu1 %v956_v9  ;;  %v972_v25 = vld [vmem:[#allocation5 + $0xf0] sm:$0xff]   ;;  %v976_v29 = vld [vmem:[#allocation5 + $0xf8] sm:$0xff]   ;;  %v43_v32 = vld [vmem:[#allocation2] sm:$0xff] }
  0x30   :  { %v973_v26 = vld [vmem:[#allocation5 + $0x30] sm:$0xff]   ;;  %v977_v30 = vld [vmem:[#allocation5 + $0x38] sm:$0xff]   ;;  %v44_v33 = vld [vmem:[#allocation2 + $0x8] sm:$0xff]  ;;  %v47_v35 = vmax.bf16 %v1087_v34, %v43_v32 }
  0x31   :  { %857 = vmatpush3.bf16.msra.mxu0 %v957_v10  ;;  %v974_v27 = vld [vmem:[#allocation5 + $0xb0] sm:$0xff]   ;;  %v978_v31 = vld [vmem:[#allocation5 + $0xb8] sm:$0xff]   ;;  %v48_v36 = vmax.bf16 %v1087_v34, %v44_v33  ;;  %v979_v37 = vld [vmem:[#allocation5 + $0x140] sm:$0xff]  }
  0x32   :  { %879 = vmatpush3.bf16.msra.mxu1 %v958_v11  ;;  %858 = vmatprep.subr.bf16.mxu0 %v959_v12  ;;  %v980_v38 = vld [vmem:[#allocation5 + $0x1c0] sm:$0xff]   ;;  %v51_v40 = vmin.bf16 %v1088_v39, %v47_v35  ;;  %v983_v48 = vld [vmem:[#allocation5 + $0x148] sm:$0xff]   ;;  %v987_v52 = vld [vmem:[#allocation5 + $0x150] sm:$0xff]  }
  0x33   :  { %880 = vmatprep.subr.bf16.mxu1 %v960_v13  ;;  %v52_v41 = vmin.bf16 %v1088_v39, %v48_v36  ;;  %v981_v42 = vld [vmem:[#allocation5 + $0x100] sm:$0xff]   ;;  %v984_v49 = vld [vmem:[#allocation5 + $0x1c8] sm:$0xff]   ;;  %v988_v53 = vld [vmem:[#allocation5 + $0x1d0] sm:$0xff]  }
  0x34   :  { %v982_v43 = vld [vmem:[#allocation5 + $0x180] sm:$0xff]   ;;  %v781_v44 = vcombine.high %v51_v40, %v51_v40  ;;  %v780_v46 = vcombine.low %v51_v40, %v51_v40  ;;  %v985_v50 = vld [vmem:[#allocation5 + $0x108] sm:$0xff]   ;;  %v989_v54 = vld [vmem:[#allocation5 + $0x110] sm:$0xff]  }
  0x35   :  { %859 = vmatpush3.bf16.msra.mxu0 %v961_v14  ;;  %v783_v45 = vcombine.high %v52_v41, %v52_v41  ;;  %v782_v47 = vcombine.low %v52_v41, %v52_v41  ;;  %v986_v51 = vld [vmem:[#allocation5 + $0x188] sm:$0xff]   ;;  %v990_v55 = vld [vmem:[#allocation5 + $0x190] sm:$0xff]   ;;  %v991_v56 = vld [vmem:[#allocation5 + $0x158] sm:$0xff]  }
  0x36   :  { %881 = vmatpush3.bf16.msra.mxu1 %v962_v15  ;;  %860 = vmatprep.subr.bf16.mxu0 %v963_v16  ;;  %v992_v57 = vld [vmem:[#allocation5 + $0x1d8] sm:$0xff]   ;;  %v995_v60 = vld [vmem:[#allocation5 + $0x160] sm:$0xff]   ;;  %v999_v0 = vld [vmem:[#allocation5 + $0x168] sm:$0xff]  }
  0x37   :  { %882 = vmatprep.subr.bf16.mxu1 %v964_v17  ;;  %634 = vmatprep.mubr.bf16.mxu0 %v781_v44  ;;  %v993_v58 = vld [vmem:[#allocation5 + $0x118] sm:$0xff]   ;;  %v996_v61 = vld [vmem:[#allocation5 + $0x1e0] sm:$0xff]   ;;  %v1000_v1 = vld [vmem:[#allocation5 + $0x1e8] sm:$0xff]  }
  0x38   :  { %674 = vmatprep.mubr.bf16.mxu1 %v783_v45  ;;  %v994_v59 = vld [vmem:[#allocation5 + $0x198] sm:$0xff]   ;;  %v997_v62 = vld [vmem:[#allocation5 + $0x120] sm:$0xff]   ;;  %v1001_v2 = vld [vmem:[#allocation5 + $0x128] sm:$0xff]  }
  0x39   :  { %861 = vmatpush3.bf16.msra.mxu0 %v965_v18  ;;  %v998_v63 = vld [vmem:[#allocation5 + $0x1a0] sm:$0xff]   ;;  %v1002_v3 = vld [vmem:[#allocation5 + $0x1a8] sm:$0xff]   ;;  %v1003_v4 = vld [vmem:[#allocation5 + $0x170] sm:$0xff]  }
  0x3a   :  { %883 = vmatpush3.bf16.msra.mxu1 %v966_v19  ;;  %862 = vmatprep.subr.bf16.mxu0 %v967_v20  ;;  %v1004_v5 = vld [vmem:[#allocation5 + $0x1f0] sm:$0xff]   ;;  %v1007_v8 = vld [vmem:[#allocation5 + $0x178] sm:$0xff]  }
  0x3b   :  { %884 = vmatprep.subr.bf16.mxu1 %v968_v21  ;;  %v1005_v6 = vld [vmem:[#allocation5 + $0x130] sm:$0xff]   ;;  %v1008_v9 = vld [vmem:[#allocation5 + $0x1f8] sm:$0xff]  }
  0x3c   :  { %v1006_v7 = vld [vmem:[#allocation5 + $0x1b0] sm:$0xff]   ;;  %v1009_v11 = vld [vmem:[#allocation5 + $0x138] sm:$0xff]  }
  0x3d   :  { %863 = vmatpush3.bf16.msra.mxu0 %v969_v22  ;;  %v45_v10 = vld [vmem:[#allocation2 + $0x10] sm:$0xff]  ;;  %v1010_v12 = vld [vmem:[#allocation5 + $0x1b8] sm:$0xff]  }
  0x3e   :  { %885 = vmatpush3.bf16.msra.mxu1 %v970_v23  ;;  %864 = vmatprep.subr.bf16.mxu0 %v971_v24  ;;  %v49_v13 = vmax.bf16 %v1087_v34, %v45_v10  ;;  %v46_v14 = vld [vmem:[#allocation2 + $0x18] sm:$0xff]  ;;  %v779_v24 = vld [vmem:[%s1166_s2] ss:$0 sm:$0xff]  ;;  %s1089_s2 = smov [#allocation7]  }
  0x3f   :  { %886 = vmatprep.subr.bf16.mxu1 %v972_v25  ;;  %v50_v15 = vmax.bf16 %v1087_v34, %v46_v14  ;;  %s769_s11 = sshll.u32 %s1089_s2, 4  ;;  %s770_s11 = int_to_ptr.vmem [resolvable:$true] %s769_s11 }
  0x40   :  { %v53_v16 = vmin.bf16 %v1088_v39, %v49_v13  ;;  %s1055_s12 = scalar_lea.vmem %s770_s11, 128  ;;  %p1060_p3 = scmp.lt.s32.totalorder %s770_s11, %s770_s11 }
  0x41   :  { %865 = vmatpush3.bf16.msra.mxu0 %v973_v26  ;;  %v54_v17 = vmin.bf16 %v1088_v39, %v50_v15  ;;  %p1056_p2 = scmp.ne.s32.totalorder %s770_s11, %s1055_s12  ;;  %p1061_p4 = scmp.lt.s32.totalorder %s1055_s12, %s1055_s12 }
  0x42   :  { %887 = vmatpush3.bf16.msra.mxu1 %v974_v27  ;;  %866 = vmatprep.subr.bf16.mxu0 %v975_v28  ;;  %v785_v18 = vcombine.high %v53_v16, %v53_v16  ;;  %v784_v19 = vcombine.low %v53_v16, %v53_v16 }
  0x43   :  { %888 = vmatprep.subr.bf16.mxu1 %v976_v29  ;;  %v787_v20 = vcombine.high %v54_v17, %v54_v17  ;;  %v786_v21 = vcombine.low %v54_v17, %v54_v17  ;;  %p1062_p5 = por %p1061_p4, %p1060_p3 }
  0x45   :  { %867 = vmatpush3.bf16.msra.mxu0 %v977_v30  ;;  %p1063_p6 = pnand %p1062_p5, %p1056_p2 }
  0x46   :  { %889 = vmatpush3.bf16.msra.mxu1 %v978_v31  ;;  %896 = vmatprep.subr.bf16.mxu0 %v979_v37 }
  0x47   :  { %918 = vmatprep.subr.bf16.mxu1 %v980_v38 }
  0x48   :  { %635 = vmatmul.mubr.bf16.vlgmr.msra.gmra.mrb[0].mxu0 %v780_v46 }
  0x49   :  { %675 = vmatmul.mubr.bf16.vlgmr.msra.gmra.mrb[0].mxu1 %v782_v47  ;;  %897 = vmatpush3.bf16.msra.mxu0 %v981_v42 }
  0x4a   :  { %919 = vmatpush3.bf16.msra.mxu1 %v982_v43  ;;  %898 = vmatprep.subr.bf16.mxu0 %v983_v48 }
  0x4b   :  { %920 = vmatprep.subr.bf16.mxu1 %v984_v49  ;;  %714 = vmatprep.mubr.bf16.mxu0 %v785_v18 }
  0x4c   :  { %754 = vmatprep.mubr.bf16.mxu1 %v787_v20 }
  0x4d   :  { %899 = vmatpush3.bf16.msra.mxu0 %v985_v50 }
  0x4e   :  { %921 = vmatpush3.bf16.msra.mxu1 %v986_v51  ;;  %900 = vmatprep.subr.bf16.mxu0 %v987_v52 }
  0x4f   :  { %922 = vmatprep.subr.bf16.mxu1 %v988_v53 }
  0x51   :  { %901 = vmatpush3.bf16.msra.mxu0 %v989_v54 }
  0x52   :  { %923 = vmatpush3.bf16.msra.mxu1 %v990_v55  ;;  %902 = vmatprep.subr.bf16.mxu0 %v991_v56 }
  0x53   :  { %924 = vmatprep.subr.bf16.mxu1 %v992_v57 }
  0x55   :  { %903 = vmatpush3.bf16.msra.mxu0 %v993_v58 }
  0x56   :  { %925 = vmatpush3.bf16.msra.mxu1 %v994_v59  ;;  %904 = vmatprep.subr.bf16.mxu0 %v995_v60 }
  0x57   :  { %926 = vmatprep.subr.bf16.mxu1 %v996_v61 }
  0x59   :  { %905 = vmatpush3.bf16.msra.mxu0 %v997_v62 }
  0x5a   :  { %927 = vmatpush3.bf16.msra.mxu1 %v998_v63  ;;  %906 = vmatprep.subr.bf16.mxu0 %v999_v0 }
  0x5b   :  { %928 = vmatprep.subr.bf16.mxu1 %v1000_v1 }
  0x5d   :  { %907 = vmatpush3.bf16.msra.mxu0 %v1001_v2 }
  0x5e   :  { %929 = vmatpush3.bf16.msra.mxu1 %v1002_v3  ;;  %908 = vmatprep.subr.bf16.mxu0 %v1003_v4 }
  0x5f   :  { %930 = vmatprep.subr.bf16.mxu1 %v1004_v5 }
  0x61   :  { %909 = vmatpush3.bf16.msra.mxu0 %v1005_v6 }
  0x62   :  { %931 = vmatpush3.bf16.msra.mxu1 %v1006_v7  ;;  %910 = vmatprep.subr.bf16.mxu0 %v1007_v8 }
  0x63   :  { %932 = vmatprep.subr.bf16.mxu1 %v1008_v9 }
  0x65   :  { %911 = vmatpush3.bf16.msra.mxu0 %v1009_v11 }
  0x66   :  { %933 = vmatpush3.bf16.msra.mxu1 %v1010_v12 }
  0x68   :  { %715 = vmatmul.mubr.bf16.vlgmr.msra.gmra.mrb[4].mxu0 %v784_v19 }
  0x69   :  { %755 = vmatmul.mubr.bf16.vlgmr.msra.gmra.mrb[4].mxu1 %v786_v21 }
 0x11b   :  { %v868_v22 = vpop.f32.mrb[0].mxu0 }
 0x11c   :  { %v890_v23 = vpop.f32.mrb[0].mxu1  ;;  %v869_v25 = vpop.f32.mrb[1].mxu0 }
 0x11d   :  { %v891_v26 = vpop.f32.mrb[1].mxu1  ;;  %v870_v27 = vadd.f32 %v869_v25, %v868_v22  ;;  %v871_v29 = vpop.f32.mrb[2].mxu0 }
 0x11e   :  { %v892_v28 = vadd.f32 %v891_v26, %v890_v23  ;;  %v893_v30 = vpop.f32.mrb[2].mxu1  ;;  %v872_v31 = vpop.f32.mrb[3].mxu0 }
 0x11f   :  { %v894_v32 = vpop.f32.mrb[3].mxu1  ;;  %v637_v33 = vadd.f32 %v870_v27, %v779_v24 }
 0x121   :  { %v677_v34 = vadd.f32 %v892_v28, %v637_v33 }
 0x13b   :  { %v912_v35 = vpop.f32.mrb[4].mxu0 }
 0x13c   :  { %v934_v36 = vpop.f32.mrb[4].mxu1  ;;  %v913_v37 = vpop.f32.mrb[5].mxu0 }
 0x13d   :  { %v914_v38 = vadd.f32 %v913_v37, %v912_v35  ;;  %v935_v39 = vpop.f32.mrb[5].mxu1  ;;  %v915_v40 = vpop.f32.mrb[6].mxu0 }
 0x13e   :  { %v936_v41 = vadd.f32 %v935_v39, %v934_v36  ;;  %v937_v42 = vpop.f32.mrb[6].mxu1  ;;  %v916_v43 = vpop.f32.mrb[7].mxu0 }
 0x13f   :  { %v717_v44 = vadd.f32 %v914_v38, %v677_v34  ;;  %v938_v45 = vpop.f32.mrb[7].mxu1 }
 0x141   :  { %v757_v46 = vadd.f32 %v936_v41, %v717_v44 }
 0x143   :  { %762 = vst [vmem:[#allocation7] sm:$0xff] %v757_v46 }
 0x144   :  { %1066 = shalt.err (!%p1063_p6)
}
 0x145   :  { %s1067_s15 = scalar_lea.hbm %s1167_s3, 128 }
 0x146   :  { %p1068_p7 = scmp.ne.s32.totalorder %s1167_s3, %s1067_s15  ;;  %p1071_p8 = scmp.lt.u32.totalorder %s1067_s15, %s1167_s3 }
 0x148   :  { %p1073_p9 = pnand %p1071_p8, %p1068_p7 }
 0x14a   :  { %1076 = shalt.err (!%p1073_p9)
}
 0x14b   :  { %772 = dma.vmem_to_hbm [thread:$0]  %s770_s11, 128, %s1167_s3, [#allocation4]  }
 0x14c   :  { %1081 = dma.done.wait [#allocation4], 128  }
 0x14d   :  { %1082 = vsyncadd [#allocation4], 4294967168 }
 0x14e   :  { %776 = vsyncpa [#allocation3], 1 }
 0x14f   :  { %777 = vsyncpa [#allocation6], 1 }
 0x150   :  { %778 = vsyncpa [#allocation4], 1 }

</bundles_post_ra>
